<compile_context>
chip_gen: v6e
topology: v6e:2x2x1
jax: 0.10.0
libtpu: 0.0.40
codegen_flags: <defaults>
</compile_context>

<pallas_src>
import functools

import jax
import jax.numpy as jnp
from jax.experimental import pallas as pl
from jax.experimental.pallas import tpu as pltpu


def _temporal_attention_kernel(x_ref, wqkv_ref, bqkv_ref, wo_ref, bo_ref,
                               mask_ref, o_ref, *, num_heads, head_dim,
                               seq_len, batch_block):
    H, C, S, BB = num_heads, head_dim, seq_len, batch_block
    D = H * C

    x = x_ref[...]                                                    # [BB*S, D] bf16

    # Fused Q/K/V projection (1/sqrt(head_dim) pre-folded into the Q columns).
    qkv = jnp.dot(x, wqkv_ref[...],
                  preferred_element_type=jnp.float32) + bqkv_ref[...]  # [BB*S, 3D] f32

    def split_heads(off):
        # -> [H*BB, S, C], ordering (head, sample). H static lane slices + one
        # stack + one leading-dim reshape; cost independent of batch_block.
        return jnp.stack(
            [qkv[:, off + h * C: off + (h + 1) * C] for h in range(H)],
            axis=0).reshape(H * BB, S, C)

    q = split_heads(0).astype(jnp.bfloat16)      # already scaled by 1/sqrt(C)
    k = split_heads(D).astype(jnp.bfloat16)
    v = split_heads(2 * D).astype(jnp.bfloat16)

    # scores[g, i, j] = <q[g, i], k[g, j]>   (g = head*BB + sample)
    scores = jnp.einsum("bic,bjc->bij", q, k,
                        preferred_element_type=jnp.float32)            # [H*BB, S, S]

    # Additive mask (0 where attended, -1e9 where masked), same for every (b, h).
    scores = scores + mask_ref[...][None, :, :]

    # Numerically stable softmax over source positions, vectorized across all
    # (head, sample) pairs. Max-subtraction guarantees denom >= 1.
    m = jnp.max(scores, axis=-1, keepdims=True)
    p = jnp.exp(scores - m)
    denom = jnp.sum(p, axis=-1, keepdims=True)
    attn = p * pl.reciprocal(denom, approx=True)

    ctx = jnp.einsum("bij,bjc->bic", attn.astype(jnp.bfloat16), v,
                     preferred_element_type=jnp.float32)               # [H*BB, S, C]

    # Merge heads: [H*BB, S, C] -> [BB*S, H*C]. H leading-dim slices + one lane
    # concat (head-major lanes, matching the reference's transpose+reshape).
    ctx_h = ctx.reshape(H, BB * S, C)
    ctx2 = jnp.concatenate([ctx_h[h] for h in range(H)], axis=-1)      # [BB*S, D]

    # Hoisted epilogue: out_proj + bias once, single full-block store.
    out = jnp.dot(ctx2.astype(jnp.bfloat16), wo_ref[...],
                  preferred_element_type=jnp.float32) + bo_ref[...]    # [BB*S, D]
    o_ref[...] = out


def temporal_attention(x, mask, params, *, num_heads, batch_block=None):
    """x: [B, S, D] f32. mask: [S, S] (1 = attend, 0 = masked) or None."""
    B, S, D = x.shape
    head_dim = D // num_heads
    if batch_block is None:
        # >= 2 grid steps keeps both v7x TensorCores busy; on single-TC chips
        # (v5e/v6e) pass batch_block=B to amortize per-grid-step overhead.
        batch_block = B // 2 if (B % 2 == 0 and B >= 2) else B
    assert B % batch_block == 0
    rows = batch_block * S

    # Host-side (free in XLA): flatten to row-major 2-D, cast MXU operands to
    # bf16, and convert the 0/1 mask into an additive 0/-1e9 mask.
    x2 = x.astype(jnp.bfloat16).reshape(B * S, D)
    if mask is None:
        add_mask = jnp.zeros((S, S), jnp.float32)
    else:
        add_mask = jnp.where(mask == 0, -1e9, 0.0).astype(jnp.float32)

    w_qkv = params["w_qkv"].astype(jnp.bfloat16)        # [D, 3D]
    b_qkv = params["b_qkv"].astype(jnp.float32)         # [1, 3D]
    w_out = params["w_out"].astype(jnp.bfloat16)        # [D, D]
    b_out = params["b_out"].astype(jnp.float32)         # [1, D]

    kernel = functools.partial(_temporal_attention_kernel,
                               num_heads=num_heads, head_dim=head_dim,
                               seq_len=S, batch_block=batch_block)
    fixed = lambda b: (0, 0)

    out2 = pl.pallas_call(
        kernel,
        out_shape=jax.ShapeDtypeStruct((B * S, D), jnp.float32),
        grid_spec=pltpu.PrefetchScalarGridSpec(
            num_scalar_prefetch=0,
            grid=(B // batch_block,),
            in_specs=[
                pl.BlockSpec((rows, D), lambda b: (b, 0)),   # x rows
                pl.BlockSpec((D, 3 * D), fixed),             # fused Wqkv (bf16)
                pl.BlockSpec((1, 3 * D), fixed),             # fused bqkv
                pl.BlockSpec((D, D), fixed),                 # Wout (bf16)
                pl.BlockSpec((1, D), fixed),                 # bout
                pl.BlockSpec((S, S), fixed),                 # additive mask
            ],
            out_specs=pl.BlockSpec((rows, D), lambda b: (b, 0)),
        ),
        compiler_params=pltpu.CompilerParams(
            dimension_semantics=("parallel",)),
    )(x2, w_qkv, b_qkv, w_out, b_out, add_mask)

    return out2.reshape(B, S, D)


def reference_forward(x, mask, p, *, num_heads):
    """Pure-JAX (f32) mirror of PyTorch TemporalAttention.forward (eval mode)."""
    B, S, D = x.shape
    C = D // num_heads

    def linear(inp, w, b):
        return inp @ w.T + b

    q = linear(x, p["wq"], p["bq"]).reshape(B, S, num_heads, C).transpose(0, 2, 1, 3)
    k = linear(x, p["wk"], p["bk"]).reshape(B, S, num_heads, C).transpose(0, 2, 1, 3)
    v = linear(x, p["wv"], p["bv"]).reshape(B, S, num_heads, C).transpose(0, 2, 1, 3)

    scores = jnp.einsum("bhic,bhjc->bhij", q, k) / jnp.sqrt(jnp.float32(C))
    if mask is not None:
        scores = jnp.where(mask[None, None, :, :] == 0, -1e9, scores)
    attn = jax.nn.softmax(scores, axis=-1)
    ctx = jnp.einsum("bhij,bhjc->bhic", attn, v)
    ctx = ctx.transpose(0, 2, 1, 3).reshape(B, S, D)
    return ctx @ p["wo"].T + p["bo"]


if __name__ == "__main__":
    # Small shapes consistent with the module: batch=4, seq=8, hidden=32, 4 heads.
    B, S, HIDDEN, HEADS = 4, 8, 32, 4
    HEAD_DIM = HIDDEN // HEADS

    key = jax.random.PRNGKey(0)
    kx, kwq, kbq, kwk, kbk, kwv, kbv, kwo, kbo = jax.random.split(key, 9)

    x = jax.random.normal(kx, (B, S, HIDDEN), dtype=jnp.float32)

    def init_linear(kw, kb):
        bound = 1.0 / (HIDDEN ** 0.5)
        w = jax.random.uniform(kw, (HIDDEN, HIDDEN), jnp.float32, -bound, bound)
        b = jax.random.uniform(kb, (HIDDEN,), jnp.float32, -bound, bound)
        return w, b

    wq, bq = init_linear(kwq, kbq)
    wk, bk = init_linear(kwk, kbk)
    wv, bv = init_linear(kwv, kbv)
    wo, bo = init_linear(kwo, kbo)

    # Optional attention mask (causal): 1 = attend, 0 = masked.
    mask = jnp.tril(jnp.ones((S, S), dtype=jnp.float32))

    # Host-side folding: single fused QKV weight; 1/sqrt(head_dim) folded into Q.
    scale = 1.0 / (HEAD_DIM ** 0.5)
    w_qkv = jnp.concatenate([wq.T * scale, wk.T, wv.T], axis=1)      # [D, 3D]
    b_qkv = jnp.concatenate([bq * scale, bk, bv])[None, :]           # [1, 3D]
    params = dict(w_qkv=w_qkv, b_qkv=b_qkv, w_out=wo.T, b_out=bo[None, :])

    out = temporal_attention(x, mask, params, num_heads=HEADS, batch_block=2)
    out = jax.block_until_ready(out)

    ref = reference_forward(
        x, mask,
        dict(wq=wq, bq=bq, wk=wk, bk=bk, wv=wv, bv=bv, wo=wo, bo=bo),
        num_heads=HEADS)

    assert out.shape == (B, S, HIDDEN)
    # Tolerance covers bf16 MXU operands + pl.reciprocal(approx=True) in softmax
    # (kernel) vs. the pure-f32 reference.
    assert jnp.allclose(out, ref, rtol=2e-2, atol=2e-2), "kernel/reference mismatch"

    print("KERNEL_OK")
</pallas_src>

<mosaic_0001>
module attributes {stable_mosaic.version = 11 : i64} {
  func.func @_temporal_attention_kernel(%arg0: i32, %arg1: memref<16x32xbf16, #tpu.memory_space<vmem>>, %arg2: memref<32x96xbf16, #tpu.memory_space<vmem>>, %arg3: memref<1x96xf32, #tpu.memory_space<vmem>>, %arg4: memref<32x32xbf16, #tpu.memory_space<vmem>>, %arg5: memref<1x32xf32, #tpu.memory_space<vmem>>, %arg6: memref<8x8xf32, #tpu.memory_space<vmem>>, %arg7: memref<16x32xf32, #tpu.memory_space<vmem>>) attributes {dimension_semantics = [#tpu.dimension_semantics<parallel>], iteration_bounds = array<i64: 2>, scalar_prefetch = 0 : i64, scratch_operands = 0 : i64, tpu.core_type = #tpu.core_type<tc>, window_params = [{transform_indices = @transform_0, window_bounds = array<i64: 16, 32>}, {pipeline_mode = #tpu.pipeline_mode<synchronous>, transform_indices = @transform_1, window_bounds = array<i64: 32, 96>}, {pipeline_mode = #tpu.pipeline_mode<synchronous>, transform_indices = @transform_2, window_bounds = array<i64: 1, 96>}, {pipeline_mode = #tpu.pipeline_mode<synchronous>, transform_indices = @transform_3, window_bounds = array<i64: 32, 32>}, {pipeline_mode = #tpu.pipeline_mode<synchronous>, transform_indices = @transform_4, window_bounds = array<i64: 1, 32>}, {pipeline_mode = #tpu.pipeline_mode<synchronous>, transform_indices = @transform_5, window_bounds = array<i64: 8, 8>}, {transform_indices = @transform_6, window_bounds = array<i64: 16, 32>}]} {
    %c0 = arith.constant 0 : index
    %c0_0 = arith.constant 0 : index
    %0 = vector.load %arg1[%c0, %c0_0] : memref<16x32xbf16, #tpu.memory_space<vmem>>, vector<16x32xbf16>
    %c0_1 = arith.constant 0 : index
    %c0_2 = arith.constant 0 : index
    %1 = vector.load %arg2[%c0_1, %c0_2] : memref<32x96xbf16, #tpu.memory_space<vmem>>, vector<32x96xbf16>
    %cst = arith.constant dense<0.000000e+00> : vector<16x96xf32>
    %2 = tpu.matmul %0, %1, %cst {dimension_numbers = #tpu.dot_dimension_numbers<[1], [0], [0], [1], [0, 0, 1, 1], [], []>} : vector<16x32xbf16>, vector<32x96xbf16>, vector<16x96xf32> -> vector<16x96xf32>
    %c0_3 = arith.constant 0 : index
    %c0_4 = arith.constant 0 : index
    %3 = vector.load %arg3[%c0_3, %c0_4] : memref<1x96xf32, #tpu.memory_space<vmem>>, vector<1x96xf32>
    %4 = vector.broadcast %3 : vector<1x96xf32> to vector<16x96xf32>
    %5 = arith.addf %2, %4 : vector<16x96xf32>
    %6 = vector.extract_strided_slice %5 {offsets = [0, 0], sizes = [16, 8], strides = [1, 1]} : vector<16x96xf32> to vector<16x8xf32>
    %7 = vector.extract_strided_slice %5 {offsets = [0, 8], sizes = [16, 8], strides = [1, 1]} : vector<16x96xf32> to vector<16x8xf32>
    %8 = vector.extract_strided_slice %5 {offsets = [0, 16], sizes = [16, 8], strides = [1, 1]} : vector<16x96xf32> to vector<16x8xf32>
    %9 = vector.extract_strided_slice %5 {offsets = [0, 24], sizes = [16, 8], strides = [1, 1]} : vector<16x96xf32> to vector<16x8xf32>
    %10 = vector.shape_cast %6 : vector<16x8xf32> to vector<1x16x8xf32>
    %11 = vector.shape_cast %7 : vector<16x8xf32> to vector<1x16x8xf32>
    %12 = vector.shape_cast %8 : vector<16x8xf32> to vector<1x16x8xf32>
    %13 = vector.shape_cast %9 : vector<16x8xf32> to vector<1x16x8xf32>
    %14 = tpu.concatenate %10, %11, %12, %13 in 0 : vector<1x16x8xf32>, vector<1x16x8xf32>, vector<1x16x8xf32>, vector<1x16x8xf32> -> vector<4x16x8xf32>
    %15 = vector.shape_cast %14 : vector<4x16x8xf32> to vector<8x8x8xf32>
    %16 = arith.truncf %15 : vector<8x8x8xf32> to vector<8x8x8xbf16>
    %17 = vector.extract_strided_slice %5 {offsets = [0, 32], sizes = [16, 8], strides = [1, 1]} : vector<16x96xf32> to vector<16x8xf32>
    %18 = vector.extract_strided_slice %5 {offsets = [0, 40], sizes = [16, 8], strides = [1, 1]} : vector<16x96xf32> to vector<16x8xf32>
    %19 = vector.extract_strided_slice %5 {offsets = [0, 48], sizes = [16, 8], strides = [1, 1]} : vector<16x96xf32> to vector<16x8xf32>
    %20 = vector.extract_strided_slice %5 {offsets = [0, 56], sizes = [16, 8], strides = [1, 1]} : vector<16x96xf32> to vector<16x8xf32>
    %21 = vector.shape_cast %17 : vector<16x8xf32> to vector<1x16x8xf32>
    %22 = vector.shape_cast %18 : vector<16x8xf32> to vector<1x16x8xf32>
    %23 = vector.shape_cast %19 : vector<16x8xf32> to vector<1x16x8xf32>
    %24 = vector.shape_cast %20 : vector<16x8xf32> to vector<1x16x8xf32>
    %25 = tpu.concatenate %21, %22, %23, %24 in 0 : vector<1x16x8xf32>, vector<1x16x8xf32>, vector<1x16x8xf32>, vector<1x16x8xf32> -> vector<4x16x8xf32>
    %26 = vector.shape_cast %25 : vector<4x16x8xf32> to vector<8x8x8xf32>
    %27 = arith.truncf %26 : vector<8x8x8xf32> to vector<8x8x8xbf16>
    %28 = vector.extract_strided_slice %5 {offsets = [0, 64], sizes = [16, 8], strides = [1, 1]} : vector<16x96xf32> to vector<16x8xf32>
    %29 = vector.extract_strided_slice %5 {offsets = [0, 72], sizes = [16, 8], strides = [1, 1]} : vector<16x96xf32> to vector<16x8xf32>
    %30 = vector.extract_strided_slice %5 {offsets = [0, 80], sizes = [16, 8], strides = [1, 1]} : vector<16x96xf32> to vector<16x8xf32>
    %31 = vector.extract_strided_slice %5 {offsets = [0, 88], sizes = [16, 8], strides = [1, 1]} : vector<16x96xf32> to vector<16x8xf32>
    %32 = vector.shape_cast %28 : vector<16x8xf32> to vector<1x16x8xf32>
    %33 = vector.shape_cast %29 : vector<16x8xf32> to vector<1x16x8xf32>
    %34 = vector.shape_cast %30 : vector<16x8xf32> to vector<1x16x8xf32>
    %35 = vector.shape_cast %31 : vector<16x8xf32> to vector<1x16x8xf32>
    %36 = tpu.concatenate %32, %33, %34, %35 in 0 : vector<1x16x8xf32>, vector<1x16x8xf32>, vector<1x16x8xf32>, vector<1x16x8xf32> -> vector<4x16x8xf32>
    %37 = vector.shape_cast %36 : vector<4x16x8xf32> to vector<8x8x8xf32>
    %38 = arith.truncf %37 : vector<8x8x8xf32> to vector<8x8x8xbf16>
    "tpu.trace_start"() <{level = 10 : i32, message = "bic,bjc->bij"}> : () -> ()
    %cst_5 = arith.constant dense<0.000000e+00> : vector<8x8x8xf32>
    %39 = tpu.matmul %16, %27, %cst_5 {dimension_numbers = #tpu.dot_dimension_numbers<[2], [2], [1], [1], [0, 0, 0, 1, 1, 1], [0], [0]>} : vector<8x8x8xbf16>, vector<8x8x8xbf16>, vector<8x8x8xf32> -> vector<8x8x8xf32>
    "tpu.trace_stop"() : () -> ()
    %c0_6 = arith.constant 0 : index
    %c0_7 = arith.constant 0 : index
    %40 = vector.load %arg6[%c0_6, %c0_7] : memref<8x8xf32, #tpu.memory_space<vmem>>, vector<8x8xf32>
    %41 = vector.shape_cast %40 : vector<8x8xf32> to vector<1x8x8xf32>
    %42 = vector.broadcast %41 : vector<1x8x8xf32> to vector<8x8x8xf32>
    %43 = arith.addf %39, %42 : vector<8x8x8xf32>
    %cst_8 = arith.constant dense<0xFF800000> : vector<8x8xf32>
    %44 = vector.multi_reduction <maximumf>, %43, %cst_8 [2] : vector<8x8x8xf32> to vector<8x8xf32>
    %45 = vector.shape_cast %44 : vector<8x8xf32> to vector<8x8x1xf32>
    %46 = vector.broadcast %45 : vector<8x8x1xf32> to vector<8x8x8xf32>
    %47 = arith.subf %43, %46 : vector<8x8x8xf32>
    %48 = math.exp %47 : vector<8x8x8xf32>
    %cst_9 = arith.constant dense<0.000000e+00> : vector<8x8xf32>
    %49 = vector.multi_reduction <add>, %48, %cst_9 [2] : vector<8x8x8xf32> to vector<8x8xf32>
    %50 = vector.shape_cast %49 : vector<8x8xf32> to vector<8x8x1xf32>
    %51 = tpu.reciprocal %50 {approx = true} : vector<8x8x1xf32> -> vector<8x8x1xf32>
    %52 = vector.broadcast %51 : vector<8x8x1xf32> to vector<8x8x8xf32>
    %53 = arith.mulf %48, %52 : vector<8x8x8xf32>
    %54 = arith.truncf %53 : vector<8x8x8xf32> to vector<8x8x8xbf16>
    "tpu.trace_start"() <{level = 10 : i32, message = "bij,bjc->bic"}> : () -> ()
    %cst_10 = arith.constant dense<0.000000e+00> : vector<8x8x8xf32>
    %55 = tpu.matmul %54, %38, %cst_10 {dimension_numbers = #tpu.dot_dimension_numbers<[2], [1], [1], [2], [0, 0, 0, 1, 1, 2], [0], [0]>} : vector<8x8x8xbf16>, vector<8x8x8xbf16>, vector<8x8x8xf32> -> vector<8x8x8xf32>
    "tpu.trace_stop"() : () -> ()
    %56 = vector.shape_cast %55 : vector<8x8x8xf32> to vector<4x16x8xf32>
    %57 = vector.extract_strided_slice %56 {offsets = [0, 0, 0], sizes = [1, 16, 8], strides = [1, 1, 1]} : vector<4x16x8xf32> to vector<1x16x8xf32>
    %58 = vector.shape_cast %57 : vector<1x16x8xf32> to vector<16x8xf32>
    %59 = vector.extract_strided_slice %56 {offsets = [1, 0, 0], sizes = [1, 16, 8], strides = [1, 1, 1]} : vector<4x16x8xf32> to vector<1x16x8xf32>
    %60 = vector.shape_cast %59 : vector<1x16x8xf32> to vector<16x8xf32>
    %61 = vector.extract_strided_slice %56 {offsets = [2, 0, 0], sizes = [1, 16, 8], strides = [1, 1, 1]} : vector<4x16x8xf32> to vector<1x16x8xf32>
    %62 = vector.shape_cast %61 : vector<1x16x8xf32> to vector<16x8xf32>
    %63 = vector.extract_strided_slice %56 {offsets = [3, 0, 0], sizes = [1, 16, 8], strides = [1, 1, 1]} : vector<4x16x8xf32> to vector<1x16x8xf32>
    %64 = vector.shape_cast %63 : vector<1x16x8xf32> to vector<16x8xf32>
    %65 = tpu.concatenate %58, %60, %62, %64 in 1 : vector<16x8xf32>, vector<16x8xf32>, vector<16x8xf32>, vector<16x8xf32> -> vector<16x32xf32>
    %66 = arith.truncf %65 : vector<16x32xf32> to vector<16x32xbf16>
    %c0_11 = arith.constant 0 : index
    %c0_12 = arith.constant 0 : index
    %67 = vector.load %arg4[%c0_11, %c0_12] : memref<32x32xbf16, #tpu.memory_space<vmem>>, vector<32x32xbf16>
    %cst_13 = arith.constant dense<0.000000e+00> : vector<16x32xf32>
    %68 = tpu.matmul %66, %67, %cst_13 {dimension_numbers = #tpu.dot_dimension_numbers<[1], [0], [0], [1], [0, 0, 1, 1], [], []>} : vector<16x32xbf16>, vector<32x32xbf16>, vector<16x32xf32> -> vector<16x32xf32>
    %c0_14 = arith.constant 0 : index
    %c0_15 = arith.constant 0 : index
    %69 = vector.load %arg5[%c0_14, %c0_15] : memref<1x32xf32, #tpu.memory_space<vmem>>, vector<1x32xf32>
    %70 = vector.broadcast %69 : vector<1x32xf32> to vector<16x32xf32>
    %71 = arith.addf %68, %70 : vector<16x32xf32>
    %c0_16 = arith.constant 0 : index
    %c0_17 = arith.constant 0 : index
    %72 = vector.load %arg7[%c0_16, %c0_17] : memref<16x32xf32, #tpu.memory_space<vmem>>, vector<16x32xf32>
    tpu.vector_store %arg7[%c0_16, %c0_17], %71 {strides = array<i32>} : memref<16x32xf32, #tpu.memory_space<vmem>>, vector<16x32xf32>,
    return
  }
  func.func @transform_0(%arg0: i32) -> (i32, i32) {
    %c0_i32 = arith.constant 0 : i32
    %c0_i32_0 = arith.constant 0 : i32
    return %arg0, %c0_i32 : i32, i32
  }
  func.func @transform_1(%arg0: i32) -> (i32, i32) {
    %c0_i32 = arith.constant 0 : i32
    %c0_i32_0 = arith.constant 0 : i32
    %c0_i32_1 = arith.constant 0 : i32
    return %c0_i32, %c0_i32_0 : i32, i32
  }
  func.func @transform_2(%arg0: i32) -> (i32, i32) {
    %c0_i32 = arith.constant 0 : i32
    %c0_i32_0 = arith.constant 0 : i32
    %c0_i32_1 = arith.constant 0 : i32
    return %c0_i32, %c0_i32_0 : i32, i32
  }
  func.func @transform_3(%arg0: i32) -> (i32, i32) {
    %c0_i32 = arith.constant 0 : i32
    %c0_i32_0 = arith.constant 0 : i32
    %c0_i32_1 = arith.constant 0 : i32
    return %c0_i32, %c0_i32_0 : i32, i32
  }
  func.func @transform_4(%arg0: i32) -> (i32, i32) {
    %c0_i32 = arith.constant 0 : i32
    %c0_i32_0 = arith.constant 0 : i32
    %c0_i32_1 = arith.constant 0 : i32
    return %c0_i32, %c0_i32_0 : i32, i32
  }
  func.func @transform_5(%arg0: i32) -> (i32, i32) {
    %c0_i32 = arith.constant 0 : i32
    %c0_i32_0 = arith.constant 0 : i32
    %c0_i32_1 = arith.constant 0 : i32
    return %c0_i32, %c0_i32_0 : i32, i32
  }
  func.func @transform_6(%arg0: i32) -> (i32, i32) {
    %c0_i32 = arith.constant 0 : i32
    %c0_i32_0 = arith.constant 0 : i32
    return %arg0, %c0_i32 : i32, i32
  }
}

</mosaic_0001>

<bundles_post_ra>
// kernel: tpu_custom_call.1
= control target key start
LH: loop header
LB: loop body
LE: loop exit
PB: predicated region body
PF: predicated region fallthrough
CT: control target
= control target key end

     0   :  { %11 = vsyncpa [#allocation3], 0  ;;  %s2496_s0 = inlined_call_operand.hbm [shape: bf16[32,32], index: 0, kind: input, shape index: {}]   ;;  %s2497_s1 = inlined_call_operand.hbm [shape: bf16[32,96], index: 1, kind: input, shape index: {}]   ;;  %s2498_s2 = inlined_call_operand.vmem [shape: f32[1,96], index: 2, kind: input, shape index: {}]   ;;  %s2499_s3 = inlined_call_operand.hbm [shape: bf16[32,32], index: 3, kind: input, shape index: {}]   ;;  %s2500_s4 = inlined_call_operand.hbm [shape: f32[1,32], index: 4, kind: input, shape index: {}]   ;;  %s2501_s5 = inlined_call_operand.vmem [shape: f32[8,8], index: 5, kind: input, shape index: {}]   ;;  %s2502_s6 = inlined_call_operand.hbm [shape: f32[32,32], index: 6, kind: output, shape index: {}]  }
   0x1   :  { %13 = vsyncpa [#allocation3 + $0x1], 0 }
   0x2   :  { %14 = vsyncpa [#allocation6], 0 }
   0x3   :  { %15 = vsyncpa [#allocation9], 0 }
   0x4   :  { %16 = vsyncpa [#allocation4], 0 }
   0x5   :  { %18 = vsyncpa [#allocation4 + $0x1], 0  ;;  %s2098_s21 = smov 0   ;;  %s2100_s22 = smov 0  }
   0x6   :  { %s2102_s23 = smov 0   ;;  %s2104_s24 = smov 0  }
   0x7 LB: > { %s2119_s25 = sadd.s32 4294967295, %s2043_s24   ;;  %s1511_s26 = sadd.s32 4294967294, %s2043_s24   ;;  %s2043_s24 = sphi %s2104_s24, %s2529_s24   ;;  %s2039_s23 = sphi %s2102_s23, %s2528_s23   ;;  %s2035_s22 = sphi %s2100_s22, %s2527_s22   ;;  %s2031_s21 = sphi %s2098_s21, %s2526_s21  }
   0x8   : > { %p44_p0 = scmp.ne.s32.totalorder %s2035_s22, %s2031_s21  ;;  %p2503_p1 = scmp.eq.s32.totalorder %s2119_s25, 0 }
   0x9   : > { %p173_p2 = scmp.eq.s32.totalorder %s2119_s25, 1  ;;  %p179_p3 = scmp.eq.s32.totalorder %s1511_s26, 1 }
   0xa   : > { %p2128_p4 = por %p2503_p1, %p44_p0  ;;  %p1512_p5 = scmp.ge.s32.totalorder %s2043_s24, 1 }
   0xb   : > { %p2133_p6 = por %p179_p3, %p44_p0  ;;  %p186_p7 = scmp.lt.s32.totalorder %s2043_s24, 3 }
   0xc   : > { %s2509_s27 = scalar_select %p2128_p4, 1, 0 }
   0xd   : > { %s2510_s28 = scalar_select %p2133_p6, 1, 0 }
   0xe   : > { %p2138_p8 = pnand %p1512_p5, %p186_p7  ;;  %s2045_s30 = smov [#allocation5]  }
   0xf   : > { %s198_s7 = sshll.u32 %s2045_s30, 4  ;;  %s2046_s9 = smov [#allocation7]   ;;  %s199_s7 = int_to_ptr.vmem [resolvable:$true] %s198_s7 }
  0x10   : > { %s2511_s29 = scalar_select %p2138_p8, 1, 0 }
  0x11   : > { %p1724_p9 = pneg %p2138_p8  ;;  %s214_s10 = sshll.u32 %s2046_s9, 4  ;;  %s215_s10 = int_to_ptr.vmem [resolvable:$true] %s214_s10 }
  0x12   : > { %s2047_s11 = smov [#allocation8]   ;;  %s1876_s13 = scalar_lea.vmem %s199_s7, 256 }
  0x13   : > { %p2147_p11 = pnand %p1724_p9, %p2503_p1  ;;  %s228_s12 = sshll.u32 %s2047_s11, 4  ;;  %s229_s12 = int_to_ptr.vmem [resolvable:$true] %s228_s12 }
  0x14   : > { %p1877_p13 = scmp.ne.s32.totalorder %s199_s7, %s1876_s13  ;;  %p1884_p5 = scmp.lt.s32.totalorder %s199_s7, %s199_s7 }
  0x15   : > { %p1867_p12 = pneg %p2147_p11  ;;  %p1885_p7 = scmp.lt.s32.totalorder %s1876_s13, %s1876_s13 }
  0x17   : > { %p1879_p0 = pnand %p1877_p13, %p1867_p12  ;;  %p1886_p9 = por %p1885_p7, %p1884_p5 }
  0x19   : > { %p1880_p3 = pneg %p1879_p0 }
  0x1b   : > { %p1887_p10 = pnand %p1886_p9, %p1880_p3 }
  0x1d   : > { %1890 = shalt.err (!%p1887_p10)
}
  0x1e   : > { %s2504_s14 = smov 64   ;;  %s2505_s15 = smov 4  }
  0x1f   : > { %1727 = dma.hbm_to_vmem [thread:$0]  (!%p2147_p11), %s2497_s1, 256, %s199_s7, [#allocation6], %s2504_s14, %s2504_s14, %s2505_s15  }
  0x20   : > { %s1902_s18 = scalar_lea.vmem %s215_s10, 256  ;;  %p1910_p3 = scmp.lt.s32.totalorder %s215_s10, %s215_s10 }
  0x21   : > { %p1903_p13 = scmp.ne.s32.totalorder %s215_s10, %s1902_s18  ;;  %p1911_p10 = scmp.lt.s32.totalorder %s1902_s18, %s1902_s18 }
  0x23   : > { %p1905_p0 = pnand %p1903_p13, %p1867_p12  ;;  %p1912_p7 = por %p1911_p10, %p1910_p3 }
  0x25   : > { %p1906_p5 = pneg %p1905_p0 }
  0x27   : > { %p1913_p9 = pnand %p1912_p7, %p1906_p5 }
  0x29   : > { %1916 = shalt.err (!%p1913_p9)
}
  0x2a   : > { %1730 = dma.hbm_to_vmem [thread:$0]  (!%p2147_p11), %s2499_s3, 256, %s215_s10, [#allocation6], %s2504_s14, %s2504_s14, %s2505_s15  }
  0x2b   : > { %s1928_s26 = scalar_lea.vmem %s229_s12, 16  ;;  %s1935_s30 = scalar_lea.vmem %s229_s12, 32 }
  0x2c   : > { %p1929_p1 = scmp.ne.s32.totalorder %s229_s12, %s1928_s26  ;;  %p1936_p5 = scmp.lt.s32.totalorder %s229_s12, %s229_s12 }
  0x2d   : > { %p1937_p3 = scmp.lt.s32.totalorder %s1935_s30, %s1928_s26 }
  0x2e   : > { %p1931_p13 = pnand %p1929_p1, %p1867_p12 }
  0x2f   : > { %p1938_p10 = por %p1937_p3, %p1936_p5 }
  0x30   : > { %p1932_p0 = pneg %p1931_p13 }
  0x32   : > { %p1939_p7 = pnand %p1938_p10, %p1932_p0 }
  0x34   : > { %1942 = shalt.err (!%p1939_p7)
}
  0x35   : > { %1733 = dma.hbm_to_vmem [thread:$0]  (!%p2147_p11), %s2500_s4, 16, %s229_s12, [#allocation9]  }
  0x36   : > { %s2184_s10 = sadd.s32 1, %s2043_s24   ;;  %s31_s8 = sadd.s32 1, %s2039_s23 }
  0x37   : > { %s28_s11 = ssub.s32 %s2043_s24, %s2184_s10  ;;  %p38_p12 = scmp.ne.s32.totalorder %s2039_s23, %s2035_s22 }
  0x38   : > { %p29_p1 = scmp.eq.s32.totalorder %s28_s11, 0  ;;  %p39_p9 = scmp.eq.s32.totalorder %s2043_s24, 0 }
  0x39   : > { %p1745_p13 = scmp.lt.s32.totalorder %s2043_s24, 2  ;;  %p2198_p5 = por %p173_p2, %p38_p12 }
  0x3a   : > { %s2194_s13 = scalar_select %p29_p1, %s2039_s23, %s31_s8  }
  0x3b   : > { %p40_p0 = por %p39_p9, %p38_p12  ;;  %s242_s17 = sand.u32 1, %s2039_s23  }
  0x3c   : > { %s2513_s16 = scalar_select %p2198_p5, 1, 0 }
  0x3d   : > { %s1556_s18 = sshll.u32 %s2043_s24, 7  ;;  %s1517_s12 = sshll.u32 %s242_s17, 3 }
  0x3e   : > { %s2207_s26 = scalar_lea.hbm %s2496_s0, %s1556_s18  ;;  %s246_s30 = scalar_lea.vmem [#allocation2], %s1517_s12 }
  0x3f   : > { %s253_s7 = sshll.u32 %s246_s30, 4  ;;  %p2209_p11 = pnand %p1745_p13, %p40_p0  ;;  %s2213_s7 = int_to_ptr.vmem [resolvable:$true] %s253_s7 }
  0x40   : > { %s2215_s11 = scalar_lea.sflag [#allocation3], %s242_s17  ;;  %s1943_s8 = scalar_lea.hbm %s2207_s26, 128 }
  0x41   : > { %p1944_p2 = scmp.ne.s32.totalorder %s2207_s26, %s1943_s8  ;;  %p1945_p3 = pneg %p2209_p11 }
  0x42   : > { %s1948_s12 = scalar_lea.hbm %s2496_s0, 256  ;;  %p1949_p1 = scmp.lt.s32.totalorder %s2207_s26, %s2496_s0 }
  0x43   : > { %p1946_p10 = pnand %p1945_p3, %p1944_p2  ;;  %p1950_p12 = scmp.lt.s32.totalorder %s1948_s12, %s1943_s8 }
  0x45   : > { %p1947_p7 = pneg %p1946_p10  ;;  %p1951_p9 = por %p1950_p12, %p1949_p1 }
  0x47   : > { %p1952_p13 = pnand %p1951_p9, %p1947_p7 }
  0x49   : > { %1955 = shalt.err (!%p1952_p13)
}
  0x4a   : > { %s1956_s17 = scalar_lea.vmem %s2213_s7, 128  ;;  %s2050_s14 = smov [#allocation2]  }
  0x4b   : > { %p1957_p0 = scmp.ne.s32.totalorder %s2213_s7, %s1956_s17  ;;  %s1961_s15 = sshll.u32 %s2050_s14, 4  ;;  %s1962_s15 = int_to_ptr.vmem [resolvable:$false] %s1961_s15 }
  0x4c   : > { %s1963_s18 = scalar_lea.vmem %s1962_s15, 256  ;;  %p1964_p10 = scmp.lt.s32.totalorder %s2213_s7, %s1962_s15 }
  0x4d   : > { %p1959_p6 = pnand %p1957_p0, %p1945_p3  ;;  %p1965_p5 = scmp.lt.s32.totalorder %s1963_s18, %s1956_s17 }
  0x4f   : > { %p1960_p2 = pneg %p1959_p6  ;;  %p1966_p4 = por %p1965_p5, %p1964_p10 }
  0x51   : > { %p1967_p8 = pnand %p1966_p4, %p1960_p2 }
  0x53   : > { %1970 = shalt.err (!%p1967_p8)
}
  0x54   : > { %s2515_s8 = smov 4   ;;  %s2516_s19 = smov 64  }
  0x55   : > { %1737 = dma.hbm_to_vmem [thread:$0]  (!%p2209_p11), %s2207_s26, 128, %s2213_s7, %s2215_s11, %s2516_s19, %s2516_s19, %s2515_s8  }
  0x56   : > { %p2517_p6 = scmp.ne.s32.totalorder %s2511_s29, 0 }
  0x57   : > { %s2242_s14 = sand.u32 (!%p2517_p6), 1, %s2035_s22   ;;  %p2518_p4 = scmp.ne.s32.totalorder (!%p2517_p6), %s2509_s27, 0 }
  0x58   : > { %265 = sbr.rel (%p2517_p6) target bundleno = 1652 (0x674), region = 44  ;;  %s1521_s15 = sshll.u32 (!%p2517_p6), %s2242_s14, 3 }
  0x59   : > { %s268_s12 = scalar_lea.sflag (!%p2517_p6), [#allocation3], %s2242_s14  ;;  %s271_s20 = scalar_lea.vmem (!%p2517_p6), [#allocation2], %s1521_s15 }
  0x5d   : > { %2014 = dma.done.wait (%p2518_p4), %s268_s12, 128  }
  0x5e   : > { %2016 = vsyncadd (%p2518_p4), %s268_s12, 4294967168  ;;  %p2519_p8 = scmp.eq.s32.totalorder %s2119_s25, 0 }
  0x60   : > { %2018 = dma.done.wait (%p2519_p8), [#allocation6], 512   ;;  %p2520_p5 = pmov %p2519_p8 }
  0x62   : > { %2020 = vsyncadd (%p2520_p5), [#allocation6], 4294966784  ;;  %p2521_p11 = pmov %p2520_p5 }
  0x63   : > { %p2522_p3 = pmov %p2520_p5 }
  0x64   : > { %2022 = dma.done.wait (%p2521_p11), [#allocation9], 16  }
  0x65   : > { %2024 = vsyncadd (%p2522_p3), [#allocation9], 4294967280  ;;  %v2051_v0 = vmov 0.0   ;;  %vm2052_vm0 = vmmov 0   ;;  %v1828_v1 = vld [vmem:[#allocation5 + $0x8] sm:$0xff]   ;;  %v1829_v2 = vld [vmem:[#allocation5] sm:$0xff]  }
  0x66   : > { %1596 = vmatprep.subr.bf16.mxu0 %v2051_v0  ;;  %1600 = vmatprep.mubr.msk.bf16.mxu0 %vm2052_vm0, %v2051_v0  ;;  %v1830_v3 = vld [vmem:[%s271_s20] sm:$0xff]   ;;  %vm345_vm1 = vcmask 261120   ;;  %s2053_s26 = smov 104   ;;  %s2054_s7 = smov 120   ;;  %vm422_vm2 = vcmask 64512   ;;  %vm913_vm3 = vcmask 1043456  }
  0x67   : > { %1604 = vmatprep.subr.bf16.mxu1 %v2051_v0  ;;  %1606 = vmatprep.mubr.msk.bf16.mxu1 %vm2052_vm0, %v2051_v0  ;;  %v1526_v5 = vld [vmem:[%s2498_s2] ss:$0 sm:$0xff]  ;;  %s2055_s9 = smov 96   ;;  %s2056_s11 = smov 112   ;;  %vm1319_vm4 = vcmask 130048   ;;  %vm1322_vm5 = vcmask 195584  }
  0x68   : > { %1597 = vmatpush3.bf16.msra.mxu0 %v1828_v1  ;;  %s2057_s30 = smov 64   ;;  %v418_v49 = vld [vmem:[%s2501_s5] sm:$0xff]  ;;  %s2058_s8 = smov 8  }
  0x69   : > { %1598 = vmatprep.subr.bf16.mxu0 %v2051_v0  ;;  %s2059_s19 = smov 16   ;;  %s2060_s15 = smov 24  }
  0x6a   : > { %s1525_s12 = sshll.u32 %s2242_s14, 4  ;;  %s1557_s29 = sshll.u32 %s2119_s25, 8 }
  0x6b   : > { %s311_s20 = scalar_lea.vmem [#allocation10], %s1525_s12  ;;  %p2523_p1 = scmp.ne.s32.totalorder %s2513_s16, 0 }
  0x6c   : > { %1599 = vmatpush3.bf16.msra.mxu0 %v1829_v2  ;;  %s1409_s27 = sshll.u32 %s311_s20, 4  ;;  %s2061_s25 = smov [#allocation10]   ;;  %s2446_s27 = int_to_ptr.vmem [resolvable:$true] %s1409_s27 }
  0x6d   : > { %1610 = vmatprep.subr.bf16.mxu0 %v2051_v0  ;;  %s1975_s17 = sshll.u32 %s2061_s25, 4  ;;  %s1976_s17 = int_to_ptr.vmem [resolvable:$false] %s1975_s17 }
  0x6e   : > { %s1977_s18 = scalar_lea.vmem %s1976_s17, 512  ;;  %p1978_p13 = scmp.lt.s32.totalorder %s2446_s27, %s1976_s17 }
  0x6f   : > { %1601 = vmatmul.mubr.msk.bf16.vlgmr.msra.gmra.mxu0 %vm345_vm1, %v1830_v3 }
  0x70   : > { %1612 = vmatprep.mubr.msk.bf16.mxu0 %vm2052_vm0, %v2051_v0 }
 0x12f   : > { %v383_v4 = vpop.f32.mrf.mxu0 }
 0x130   : > { %v384_v8 = vadd.f32 %v1526_v5, %v383_v4 }
 0x131   : > { %v1602_v6 = vpop.f32.mrf.mxu0 }
 0x132   : > { %v410_v12 = vpack.c.bf16 %v384_v8, %v384_v8 }
 0x133   : > { %v386_v7 = vpop.f32.mrf.mxu0 }
 0x134   : > { %v387_v9 = vadd.f32 %v1526_v5, %v386_v7 }
 0x135   : > { %v1603_v10 = vpop.f32.mrf.mxu0 }
 0x136   : > { %v1808_v11 = vpack.i.bf16 %v387_v9, %v384_v8  ;;  %v411_v13 = vpack.c.bf16 %v387_v9, %v387_v9 }
 0x138   : > { %1809 = vrot.lane.b32.xlu1 %v1808_v11, %s2053_s26  ;;  %1799 = vrot.lane.b32.xlu0 %v1808_v11, %s2054_s7 }
 0x13c   : > { %420 = vrot.lane.b32.xlu1 %v410_v12, %s2055_s9  ;;  %1804 = vrot.lane.b32.xlu0 %v1808_v11, %s2056_s11  ;;  %s1396_s11 = scalar_lea.sflag [#allocation4], %s2242_s14 }
 0x140   : > { %470 = vrot.lane.b32.xlu0 %v411_v13, %s2055_s9 }
 0x1aa   : > { %v1810_v14 = vpop.permute.xlu1 %1809  ;;  %v1800_v15 = vpop.permute.xlu0 %1799 }
 0x1ab   : > { %v1802_v16 = vunpack.i.h.bf16 %v1800_v15  ;;  %v1801_v17 = vunpack.i.l.bf16 %v1800_v15  ;;  %v1811_v25 = vunpack.i.l.bf16 %v1810_v14  ;;  %v1812_v28 = vunpack.i.h.bf16 %v1810_v14 }
 0x1ad   : > { %v2274_v18 = vpack.c.bf16 %v1802_v16, %v1802_v16  ;;  %v2276_v19 = vpack.c.bf16 %v1801_v17, %v1801_v17  ;;  %v2293_v31 = vpack.c.bf16 %v1811_v25, %v1811_v25  ;;  %v2296_v32 = vpack.c.bf16 %v1812_v28, %v1812_v28 }
 0x1ae   : > { %v421_v20 = vpop.permute.xlu1 %420  ;;  %v1805_v21 = vpop.permute.xlu0 %1804 }
 0x1af   : > { %v1807_v22 = vunpack.i.h.bf16 %v1805_v21  ;;  %v1806_v23 = vunpack.i.l.bf16 %v1805_v21  ;;  %519 = vrot.lane.b32.xlu1 %v2276_v19, %s2055_s9  ;;  %568 = vrot.lane.b32.xlu0 %v2274_v18, %s2055_s9  ;;  %v427_v24 = vsel %vm422_vm2, %v421_v20, 0 }
 0x1b0   : > { %1605 = vmatpush3.bf16.xpose.msra.mxu1 %v427_v24 }
 0x1b1   : > { %v2283_v26 = vpack.c.bf16 %v1807_v22, %v1807_v22  ;;  %v2285_v27 = vpack.c.bf16 %v1806_v23, %v1806_v23  ;;  %1616 = vmatprep.subr.bf16.mxu1 %v2051_v0 }
 0x1b2   : > { %v471_v29 = vpop.permute.xlu0 %470 }
 0x1b3   : > { %v476_v30 = vsel %vm422_vm2, %v471_v29, 0  ;;  %617 = vrot.lane.b32.xlu1 %v2285_v27, %s2055_s9  ;;  %666 = vrot.lane.b32.xlu0 %v2283_v26, %s2055_s9 }
 0x1b4   : > { %1611 = vmatpush3.bf16.xpose.msra.mxu0 %v476_v30 }
 0x1b5   : > { %1622 = vmatprep.subr.bf16.mxu0 %v2051_v0 }
 0x1b7   : > { %1607 = vmatmul.mubr.msk.bf16.vlgmr.msra.gmra.mxu1 %vm422_vm2, %v410_v12  ;;  %715 = vrot.lane.b32.xlu1 %v2293_v31, %s2055_s9 }
 0x1b8   : > { %764 = vrot.lane.b32.xlu0 %v2296_v32, %s2055_s9  ;;  %1618 = vmatprep.mubr.msk.bf16.mxu1 %vm2052_vm0, %v2051_v0  ;;  %s2451_s9 = scalar_lea.hbm %s2502_s6, %s1557_s29 }
 0x1bb   : > { %957 = vrot.lane.b32.xlu1 %v411_v13, %s2057_s30  ;;  %1613 = vmatmul.mubr.msk.bf16.vlgmr.msra.gmra.mxu0 %vm422_vm2, %v411_v13 }
 0x1bc   : > { %908 = vrot.lane.b32.xlu0 %v410_v12, %s2057_s30  ;;  %1624 = vmatprep.mubr.msk.bf16.mxu0 %vm2052_vm0, %v2051_v0 }
 0x221   : > { %v520_v33 = vpop.permute.xlu1 %519  ;;  %v569_v34 = vpop.permute.xlu0 %568 }
 0x222   : > { %v525_v35 = vsel %vm422_vm2, %v520_v33, 0  ;;  %v574_v36 = vsel %vm422_vm2, %v569_v34, 0 }
 0x223   : > { %1617 = vmatpush3.bf16.xpose.msra.mxu1 %v525_v35  ;;  %1623 = vmatpush3.bf16.xpose.msra.mxu0 %v574_v36 }
 0x224   : > { %1628 = vmatprep.subr.bf16.mxu1 %v2051_v0  ;;  %1634 = vmatprep.subr.bf16.mxu0 %v2051_v0 }
 0x225   : > { %v618_v37 = vpop.permute.xlu1 %617  ;;  %v667_v38 = vpop.permute.xlu0 %666 }
 0x226   : > { %v623_v39 = vsel %vm422_vm2, %v618_v37, 0  ;;  %v672_v40 = vsel %vm422_vm2, %v667_v38, 0 }
 0x229   : > { %v716_v41 = vpop.permute.xlu1 %715 }
 0x22a   : > { %1619 = vmatmul.mubr.msk.bf16.vlgmr.msra.gmra.mxu1 %vm422_vm2, %v2276_v19  ;;  %1625 = vmatmul.mubr.msk.bf16.vlgmr.msra.gmra.mxu0 %vm422_vm2, %v2274_v18  ;;  %v765_v42 = vpop.permute.xlu0 %764  ;;  %v721_v43 = vsel %vm422_vm2, %v716_v41, 0 }
 0x22b   : > { %1629 = vmatpush3.bf16.xpose.msra.mxu1 %v623_v39  ;;  %1635 = vmatpush3.bf16.xpose.msra.mxu0 %v672_v40  ;;  %v770_v44 = vsel %vm422_vm2, %v765_v42, 0 }
 0x22c   : > { %1630 = vmatprep.mubr.msk.bf16.mxu1 %vm2052_vm0, %v2051_v0  ;;  %1636 = vmatprep.mubr.msk.bf16.mxu0 %vm2052_vm0, %v2051_v0 }
 0x22d   : > { %1640 = vmatprep.subr.bf16.mxu1 %v2051_v0  ;;  %1646 = vmatprep.subr.bf16.mxu0 %v2051_v0  ;;  %v958_v45 = vpop.permute.xlu1 %957 }
 0x22e   : > { %v909_v46 = vpop.permute.xlu0 %908  ;;  %v963_v47 = vsel %vm913_vm3, %v958_v45, 0 }
 0x22f   : > { %v915_v48 = vsel %vm913_vm3, %v909_v46, 0 }
 0x232   : > { %1631 = vmatmul.mubr.msk.bf16.vlgmr.msra.gmra.mxu1 %vm422_vm2, %v2285_v27  ;;  %1637 = vmatmul.mubr.msk.bf16.vlgmr.msra.gmra.mxu0 %vm422_vm2, %v2283_v26 }
 0x233   : > { %1641 = vmatpush3.bf16.xpose.msra.mxu1 %v721_v43  ;;  %1647 = vmatpush3.bf16.xpose.msra.mxu0 %v770_v44 }
 0x234   : > { %1642 = vmatprep.mubr.msk.bf16.mxu1 %vm2052_vm0, %v2051_v0  ;;  %1648 = vmatprep.mubr.msk.bf16.mxu0 %vm2052_vm0, %v2051_v0 }
 0x235   : > { %1652 = vmatprep.subr.bf16.mxu1 %v2051_v0  ;;  %1658 = vmatprep.subr.bf16.mxu0 %v2051_v0 }
 0x23a   : > { %1643 = vmatmul.mubr.msk.bf16.vlgmr.msra.gmra.mxu1 %vm422_vm2, %v2293_v31  ;;  %1649 = vmatmul.mubr.msk.bf16.vlgmr.msra.gmra.mxu0 %vm422_vm2, %v2296_v32 }
 0x23b   : > { %1653 = vmatpush3.bf16.msra.mxu1 %v915_v48  ;;  %1659 = vmatpush3.bf16.msra.mxu0 %v963_v47 }
 0x23c   : > { %1654 = vmatprep.mubr.msk.bf16.mxu1 %vm2052_vm0, %v2051_v0  ;;  %1660 = vmatprep.mubr.msk.bf16.mxu0 %vm2052_vm0, %v2051_v0 }
 0x23d   : > { %1664 = vmatprep.subr.bf16.mxu1 %v2051_v0  ;;  %1670 = vmatprep.subr.bf16.mxu0 %v2051_v0 }
 0x277   : > { %v463_v50 = vpop.f32.mrf.mxu1 }
 0x278   : > { %v464_v51 = vadd.f32 %v463_v50, %v418_v49 }
 0x279   : > { %v1608_v52 = vpop.f32.mrf.mxu1 }
 0x27a   : > { %v812_v53 = vsel %vm422_vm2, %v464_v51, -inf }
 0x27b   : > { %v466_v54 = vpop.f32.mrf.mxu1  ;;  %813 = vmax.xlane.f32.xlu1 %v812_v53  ;;  %v512_v55 = vpop.f32.mrf.mxu0 }
 0x27c   : > { %v513_v56 = vadd.f32 %v512_v55, %v418_v49 }
 0x27d   : > { %v1609_v57 = vpop.f32.mrf.mxu1  ;;  %v1614_v58 = vpop.f32.mrf.mxu0 }
 0x27e   : > { %v815_v59 = vsel %vm422_vm2, %v513_v56, -inf }
 0x27f   : > { %816 = vmax.xlane.f32.xlu0 %v815_v59  ;;  %v515_v60 = vpop.f32.mrf.mxu0 }
 0x281   : > { %v1615_v61 = vpop.f32.mrf.mxu0 }
 0x2ea   : > { %v561_v62 = vpop.f32.mrf.mxu1  ;;  %v610_v63 = vpop.f32.mrf.mxu0 }
 0x2eb   : > { %v562_v1 = vadd.f32 %v561_v62, %v418_v49  ;;  %v611_v2 = vadd.f32 %v610_v63, %v418_v49 }
 0x2ec   : > { %v1620_v3 = vpop.f32.mrf.mxu1  ;;  %v1626_v4 = vpop.f32.mrf.mxu0 }
 0x2ed   : > { %v818_v5 = vsel %vm422_vm2, %v562_v1, -inf  ;;  %v821_v6 = vsel %vm422_vm2, %v611_v2, -inf }
 0x2ee   : > { %v564_v7 = vpop.f32.mrf.mxu1  ;;  %819 = vmax.xlane.f32.xlu0 %v818_v5  ;;  %822 = vmax.xlane.f32.xlu1 %v821_v6  ;;  %v613_v8 = vpop.f32.mrf.mxu0 }
 0x2f0   : > { %v1621_v9 = vpop.f32.mrf.mxu1  ;;  %v1627_v10 = vpop.f32.mrf.mxu0 }
 0x2f2   : > { %v659_v11 = vpop.f32.mrf.mxu1  ;;  %v708_v12 = vpop.f32.mrf.mxu0 }
 0x2f3   : > { %v2357_v13 = vadd.f32 %v659_v11, %v418_v49  ;;  %v709_v14 = vadd.f32 %v708_v12, %v418_v49 }
 0x2f4   : > { %v1632_v15 = vpop.f32.mrf.mxu1  ;;  %v1638_v16 = vpop.f32.mrf.mxu0 }
 0x2f5   : > { %v824_v17 = vsel %vm422_vm2, %v2357_v13, -inf  ;;  %v827_v20 = vsel %vm422_vm2, %v709_v14, -inf }
 0x2f6   : > { %v662_v21 = vpop.f32.mrf.mxu1  ;;  %825 = vmax.xlane.f32.xlu0 %v824_v17  ;;  %828 = vmax.xlane.f32.xlu1 %v827_v20  ;;  %v711_v22 = vpop.f32.mrf.mxu0 }
 0x2f8   : > { %v1633_v23 = vpop.f32.mrf.mxu1  ;;  %v1639_v24 = vpop.f32.mrf.mxu0 }
 0x2fa   : > { %v757_v25 = vpop.f32.mrf.mxu1  ;;  %v806_v28 = vpop.f32.mrf.mxu0 }
 0x2fb   : > { %v2362_v29 = vadd.f32 %v757_v25, %v418_v49  ;;  %v807_v30 = vadd.f32 %v806_v28, %v418_v49 }
 0x2fc   : > { %v1644_v33 = vpop.f32.mrf.mxu1  ;;  %v1650_v34 = vpop.f32.mrf.mxu0 }
 0x2fd   : > { %v830_v35 = vsel %vm422_vm2, %v2362_v29, -inf  ;;  %v833_v36 = vsel %vm422_vm2, %v807_v30, -inf }
 0x2fe   : > { %v760_v37 = vpop.f32.mrf.mxu1  ;;  %831 = vmax.xlane.f32.xlu0 %v830_v35  ;;  %834 = vmax.xlane.f32.xlu1 %v833_v36  ;;  %v809_v38 = vpop.f32.mrf.mxu0 }
 0x300   : > { %v1645_v39 = vpop.f32.mrf.mxu1  ;;  %v1651_v40 = vpop.f32.mrf.mxu0 }
 0x304   : > { %v814_v41 = vpop.xlane.xlu1 %813 }
 0x305   : > { %v836_v43 = vsub.f32 %v464_v51, %v814_v41 }
 0x307   : > { %v844_v45 = vmul.f32 1.442695, %v836_v43 }
 0x308   : > { %v817_v42 = vpop.xlane.xlu0 %816 }
 0x309   : > { %v837_v44 = vsub.f32 %v513_v56, %v817_v42  ;;  %1833 = vpow2.f32 %v844_v45 }
 0x30b   : > { %v846_v46 = vmul.f32 1.442695, %v837_v44 }
 0x30d   : > { %1835 = vpow2.f32 %v846_v46 }
 0x30f   : > { %1005 = vrot.lane.b32.xlu1 %v2276_v19, %s2057_s30 }
 0x314   : > { %1053 = vrot.lane.b32.xlu0 %v2274_v18, %s2057_s30 }
 0x316   : > { %v1834_v47 = vpop.eup %1833 }
 0x317   : > { %v860_v49 = vsel %vm422_vm2, %v1834_v47, 0.0 }
 0x31a   : > { %v1836_v48 = vpop.eup %1835 }
 0x31b   : > { %v863_v50 = vsel %vm422_vm2, %v1836_v48, 0.0 }
 0x333   : > { %861 = vadd.xlane.f32.xlu0 %v860_v49  ;;  %864 = vadd.xlane.f32.xlu1 %v863_v50 }
 0x344   : > { %1101 = vrot.lane.b32.xlu1 %v2285_v27, %s2057_s30 }
 0x377   : > { %v820_v18 = vpop.xlane.xlu0 %819  ;;  %v823_v19 = vpop.xlane.xlu1 %822 }
 0x378   : > { %v838_v52 = vsub.f32 %v562_v1, %v820_v18  ;;  %v839_v51 = vsub.f32 %v611_v2, %v823_v19 }
 0x37a   : > { %v848_v53 = vmul.f32 1.442695, %v838_v52  ;;  %v850_v54 = vmul.f32 1.442695, %v839_v51 }
 0x37c   : > { %1837 = vpow2.f32 %v848_v53 }
 0x37d   : > { %1839 = vpow2.f32 %v850_v54 }
 0x37f   : > { %v829_v55 = vpop.xlane.xlu1 %828  ;;  %v826_v5 = vpop.xlane.xlu0 %825 }
 0x380   : > { %v841_v56 = vsub.f32 %v709_v14, %v829_v55  ;;  %v840_v6 = vsub.f32 %v2357_v13, %v826_v5 }
 0x382   : > { %v854_v57 = vmul.f32 1.442695, %v841_v56  ;;  %v852_v8 = vmul.f32 1.442695, %v840_v6 }
 0x384   : > { %1841 = vpow2.f32 %v854_v57 }
 0x387   : > { %v835_v58 = vpop.xlane.xlu1 %834  ;;  %v832_v7 = vpop.xlane.xlu0 %831 }
 0x388   : > { %v843_v59 = vsub.f32 %v807_v30, %v835_v58  ;;  %v842_v9 = vsub.f32 %v2362_v29, %v832_v7 }
 0x389   : > { %v1838_v60 = vpop.eup %1837 }
 0x38a   : > { %v1840_v61 = vpop.eup %1839  ;;  %v858_v62 = vmul.f32 1.442695, %v843_v59  ;;  %v866_v63 = vsel %vm422_vm2, %v1838_v60, 0.0  ;;  %v856_v10 = vmul.f32 1.442695, %v842_v9 }
 0x38b   : > { %867 = vadd.xlane.f32.xlu0 %v866_v63  ;;  %v869_v27 = vsel %vm422_vm2, %v1840_v61, 0.0  ;;  %v1054_v11 = vpop.permute.xlu0 %1053  ;;  %v1006_v12 = vpop.permute.xlu1 %1005 }
 0x38c   : > { %870 = vadd.xlane.f32.xlu1 %v869_v27  ;;  %1843 = vpow2.f32 %v858_v62  ;;  %v1011_v25 = vsel %vm913_vm3, %v1006_v12, 0  ;;  %v1059_v28 = vsel %vm913_vm3, %v1054_v11, 0 }
 0x38d   : > { %1845 = vpow2.f32 %v852_v8 }
 0x38e   : > { %1847 = vpow2.f32 %v856_v10 }
 0x391   : > { %v2377_v1 = vpop.eup %1841 }
 0x392   : > { %v875_v2 = vsel %vm422_vm2, %v2377_v1, 0.0 }
 0x393   : > { %876 = vadd.xlane.f32.xlu1 %v875_v2 }
 0x399   : > { %v2381_v3 = vpop.eup %1843 }
 0x39a   : > { %v881_v4 = vsel %vm422_vm2, %v2381_v3, 0.0  ;;  %v2391_v14 = vpop.eup %1845 }
 0x39b   : > { %882 = vadd.xlane.f32.xlu1 %v881_v4  ;;  %v2395_v13 = vpop.eup %1847 }
 0x3a1   : > { %1149 = vrot.lane.b32.xlu0 %v2283_v26, %s2057_s30  ;;  %v872_v26 = vsel %vm422_vm2, %v2391_v14, 0.0 }
 0x3ac   : > { %1197 = vrot.lane.b32.xlu1 %v2293_v31, %s2057_s30  ;;  %v878_v31 = vsel %vm422_vm2, %v2395_v13, 0.0 }
 0x3bc   : > { %v862_v15 = vpop.xlane.xlu0 %861  ;;  %v865_v16 = vpop.xlane.xlu1 %864 }
 0x3bd   : > { %1849 = vrcp.f32 %v862_v15 }
 0x3be   : > { %1851 = vrcp.f32 %v865_v16 }
 0x3c0   : > { %873 = vadd.xlane.f32.xlu0 %v872_v26  ;;  %v1102_v29 = vpop.permute.xlu1 %1101 }
 0x3c1   : > { %v1107_v42 = vsel %vm913_vm3, %v1102_v29, 0 }
 0x3c4   : > { %879 = vadd.xlane.f32.xlu0 %v878_v31 }
 0x3ca   : > { %v1850_v17 = vpop.eup %1849 }
 0x3cb   : > { %v1852_v20 = vpop.eup %1851  ;;  %v892_v21 = vmul.f32 %v1850_v17, %v1834_v47 }
 0x3cc   : > { %v893_v22 = vmul.f32 %v1852_v20, %v1836_v48 }
 0x3cd   : > { %v900_v23 = vpack.c.bf16 %v892_v21, %v892_v21 }
 0x3ce   : > { %v901_v24 = vpack.c.bf16 %v893_v22, %v893_v22 }
 0x3cf   : > { %1655 = vmatmul.mubr.msk.bf16.vlgmr.msra.gmra.mxu1 %vm422_vm2, %v900_v23  ;;  %v1832_v23 = vld [vmem:[#allocation7] sm:$0xff]  }
 0x3d0   : > { %1661 = vmatmul.mubr.msk.bf16.vlgmr.msra.gmra.mxu0 %vm422_vm2, %v901_v24  ;;  %1665 = vmatpush3.bf16.msra.mxu1 %v1011_v25 }
 0x3d1   : > { %1671 = vmatpush3.bf16.msra.mxu0 %v1059_v28  ;;  %1666 = vmatprep.mubr.msk.bf16.mxu1 %vm2052_vm0, %v2051_v0 }
 0x3d2   : > { %1672 = vmatprep.mubr.msk.bf16.mxu0 %vm2052_vm0, %v2051_v0  ;;  %1676 = vmatprep.subr.bf16.mxu1 %v2051_v0 }
 0x3d3   : > { %1682 = vmatprep.subr.bf16.mxu0 %v2051_v0 }
 0x3da   : > { %1245 = vrot.lane.b32.xlu0 %v2296_v32, %s2057_s30  ;;  %s1971_s30 = scalar_lea.vmem %s2446_s27, 256 }
 0x3db   : > { %p1972_p7 = scmp.ne.s32.totalorder %s2446_s27, %s1971_s30  ;;  %p1979_p0 = scmp.lt.s32.totalorder %s1977_s18, %s1971_s30 }
 0x3dd   : > { %p1973_p12 = pnand %p1972_p7, %p2523_p1  ;;  %p1980_p2 = por %p1979_p0, %p1978_p13 }
 0x3df   : > { %p1974_p9 = pneg %p1973_p12 }
 0x3e1   : > { %p1981_p10 = pnand %p1980_p2, %p1974_p9 }
 0x414   : > { %v868_v30 = vpop.xlane.xlu0 %867 }
 0x415   : > { %1853 = vrcp.f32 %v868_v30  ;;  %v871_v33 = vpop.xlane.xlu1 %870 }
 0x416   : > { %1855 = vrcp.f32 %v871_v33 }
 0x418   : > { %v1150_v39 = vpop.permute.xlu0 %1149 }
 0x419   : > { %v1155_v32 = vsel %vm913_vm3, %v1150_v39, 0 }
 0x41c   : > { %v877_v34 = vpop.xlane.xlu1 %876 }
 0x41d   : > { %1857 = vrcp.f32 %v877_v34 }
 0x422   : > { %v1854_v35 = vpop.eup %1853 }
 0x423   : > { %v1856_v36 = vpop.eup %1855  ;;  %v894_v37 = vmul.f32 %v1854_v35, %v1838_v60 }
 0x424   : > { %v895_v38 = vmul.f32 %v1856_v36, %v1840_v61  ;;  %v883_v46 = vpop.xlane.xlu1 %882 }
 0x425   : > { %v902_v40 = vpack.c.bf16 %v894_v37, %v894_v37  ;;  %1859 = vrcp.f32 %v883_v46 }
 0x426   : > { %v903_v41 = vpack.c.bf16 %v895_v38, %v895_v38 }
 0x427   : > { %1667 = vmatmul.mubr.msk.bf16.vlgmr.msra.gmra.mxu1 %vm422_vm2, %v902_v40 }
 0x428   : > { %1673 = vmatmul.mubr.msk.bf16.vlgmr.msra.gmra.mxu0 %vm422_vm2, %v903_v41  ;;  %1677 = vmatpush3.bf16.msra.mxu1 %v1107_v42  ;;  %v1198_v54 = vpop.permute.xlu1 %1197 }
 0x429   : > { %1683 = vmatpush3.bf16.msra.mxu0 %v1155_v32  ;;  %1684 = vmatprep.mubr.msk.bf16.mxu0 %vm2052_vm0, %v2051_v0  ;;  %v1203_v57 = vsel %vm913_vm3, %v1198_v54, 0 }
 0x42a   : > { %1694 = vmatprep.subr.bf16.mxu0 %v2051_v0  ;;  %1678 = vmatprep.mubr.msk.bf16.mxu1 %vm2052_vm0, %v2051_v0  ;;  %v1858_v43 = vpop.eup %1857 }
 0x42b   : > { %1688 = vmatprep.subr.bf16.mxu1 %v2051_v0  ;;  %v897_v44 = vmul.f32 %v1858_v43, %v2377_v1 }
 0x42d   : > { %v905_v45 = vpack.c.bf16 %v897_v44, %v897_v44 }
 0x430   : > { %1685 = vmatmul.mubr.msk.bf16.vlgmr.msra.gmra.mxu0 %vm422_vm2, %v905_v45 }
 0x431   : > { %1696 = vmatprep.mubr.msk.bf16.mxu0 %vm2052_vm0, %v2051_v0 }
 0x432   : > { %v1860_v48 = vpop.eup %1859 }
 0x433   : > { %v899_v50 = vmul.f32 %v1860_v48, %v2381_v3 }
 0x435   : > { %v907_v52 = vpack.c.bf16 %v899_v50, %v899_v50 }
 0x449   : > { %v874_v47 = vpop.xlane.xlu0 %873 }
 0x44a   : > { %1861 = vrcp.f32 %v874_v47 }
 0x44d   : > { %v880_v49 = vpop.xlane.xlu0 %879 }
 0x44e   : > { %1863 = vrcp.f32 %v880_v49 }
 0x451   : > { %v1246_v18 = vpop.permute.xlu0 %1245 }
 0x452   : > { %v1251_v19 = vsel %vm913_vm3, %v1246_v18, 0  ;;  %v1547_v18 = vld [vmem:[#allocation8] ss:$0 sm:$0xff] }
 0x453   : > { %1695 = vmatpush3.bf16.msra.mxu0 %v1251_v19 }
 0x456   : > { %1697 = vmatmul.mubr.msk.bf16.vlgmr.msra.gmra.mxu0 %vm422_vm2, %v907_v52 }
 0x457   : > { %v1862_v51 = vpop.eup %1861 }
 0x458   : > { %v896_v53 = vmul.f32 %v1862_v51, %v2391_v14 }
 0x45a   : > { %v904_v55 = vpack.c.bf16 %v896_v53, %v896_v53 }
 0x45b   : > { %v1864_v56 = vpop.eup %1863 }
 0x45c   : > { %1679 = vmatmul.mubr.msk.bf16.vlgmr.msra.gmra.mxu1 %vm422_vm2, %v904_v55  ;;  %v898_v58 = vmul.f32 %v1864_v56, %v2395_v13  ;;  %v1831_v13 = vld [vmem:[#allocation7 + $0x8] sm:$0xff]  }
 0x45d   : > { %1689 = vmatpush3.bf16.msra.mxu1 %v1203_v57  ;;  %1690 = vmatprep.mubr.msk.bf16.mxu1 %vm2052_vm0, %v2051_v0 }
 0x45e   : > { %1700 = vmatprep.subr.bf16.mxu1 %v2051_v0  ;;  %v906_v59 = vpack.c.bf16 %v898_v58, %v898_v58 }
 0x464   : > { %1691 = vmatmul.mubr.msk.bf16.vlgmr.msra.gmra.mxu1 %vm422_vm2, %v906_v59 }
 0x465   : > { %1704 = vmatprep.mubr.msk.bf16.mxu1 %vm2052_vm0, %v2051_v0  ;;  %1701 = vmatpush3.bf16.msra.mxu1 %v1831_v13 }
 0x466   : > { %1702 = vmatprep.subr.bf16.mxu1 %v2051_v0 }
 0x469   : > { %1703 = vmatpush3.bf16.msra.mxu1 %v1832_v23 }
 0x48f   : > { %v951_v60 = vpop.f32.mrf.mxu1 }
 0x490   : > { %v999_v61 = vpop.f32.mrf.mxu0 }
 0x491   : > { %v1656_v62 = vpop.f32.mrf.mxu1 }
 0x492   : > { %v1662_v63 = vpop.f32.mrf.mxu0 }
 0x493   : > { %v954_v27 = vpop.f32.mrf.mxu1 }
 0x494   : > { %v1002_v1 = vpop.f32.mrf.mxu0 }
 0x495   : > { %v1657_v2 = vpop.f32.mrf.mxu1 }
 0x496   : > { %v1663_v3 = vpop.f32.mrf.mxu0 }
 0x4e7   : > { %v1047_v4 = vpop.f32.mrf.mxu1 }
 0x4e8   : > { %v1095_v5 = vpop.f32.mrf.mxu0 }
 0x4e9   : > { %v1813_v6 = vpack.i.bf16 %v1095_v5, %v1047_v4  ;;  %v1668_v7 = vpop.f32.mrf.mxu1 }
 0x4ea   : > { %v1674_v8 = vpop.f32.mrf.mxu0 }
 0x4eb   : > { %1814 = vrot.lane.b32.xlu1 %v1813_v6, %s2058_s8  ;;  %v1050_v9 = vpop.f32.mrf.mxu1 }
 0x4ec   : > { %v1098_v10 = vpop.f32.mrf.mxu0 }
 0x4ed   : > { %v1669_v11 = vpop.f32.mrf.mxu1 }
 0x4ee   : > { %v1675_v12 = vpop.f32.mrf.mxu0 }
 0x4f0   : > { %v1191_v14 = vpop.f32.mrf.mxu0 }
 0x4f2   : > { %v1686_v15 = vpop.f32.mrf.mxu0 }
 0x4f4   : > { %v1194_v16 = vpop.f32.mrf.mxu0 }
 0x4f6   : > { %v1687_v26 = vpop.f32.mrf.mxu0 }
 0x516   : > { %v1287_v31 = vpop.f32.mrf.mxu0 }
 0x518   : > { %v1698_v17 = vpop.f32.mrf.mxu0 }
 0x51a   : > { %v1290_v20 = vpop.f32.mrf.mxu0 }
 0x51c   : > { %v1143_v21 = vpop.f32.mrf.mxu1  ;;  %v1699_v22 = vpop.f32.mrf.mxu0 }
 0x51d   : > { %v1818_v24 = vpack.i.bf16 %v1191_v14, %v1143_v21 }
 0x51e   : > { %v1680_v25 = vpop.f32.mrf.mxu1 }
 0x51f   : > { %1819 = vrot.lane.b32.xlu0 %v1818_v24, %s2059_s19 }
 0x520   : > { %v1146_v28 = vpop.f32.mrf.mxu1 }
 0x522   : > { %v1681_v29 = vpop.f32.mrf.mxu1 }
 0x524   : > { %v1239_v30 = vpop.f32.mrf.mxu1 }
 0x525   : > { %v1823_v33 = vpack.i.bf16 %v1287_v31, %v1239_v30 }
 0x526   : > { %v1692_v34 = vpop.f32.mrf.mxu1 }
 0x527   : > { %1824 = vrot.lane.b32.xlu1 %v1823_v33, %s2060_s15 }
 0x528   : > { %v1242_v35 = vpop.f32.mrf.mxu1 }
 0x52a   : > { %v1693_v36 = vpop.f32.mrf.mxu1 }
 0x55d   : > { %v1815_v0 = vpop.permute.xlu1 %1814 }
 0x55e   : > { %v1817_v38 = vunpack.i.h.bf16 %v1815_v0  ;;  %v1816_v39 = vunpack.i.l.bf16 %v1815_v0 }
 0x560   : > { %v1318_v32 = vsel %vm422_vm2, %v999_v61, %v1817_v38  ;;  %v1317_v43 = vsel %vm422_vm2, %v951_v60, %v1816_v39 }
 0x591   : > { %v1820_v37 = vpop.permute.xlu0 %1819 }
 0x592   : > { %v1822_v40 = vunpack.i.h.bf16 %v1820_v37  ;;  %v1821_v41 = vunpack.i.l.bf16 %v1820_v37 }
 0x594   : > { %v1321_v46 = vsel %vm1319_vm4, %v1318_v32, %v1822_v40  ;;  %v1320_v47 = vsel %vm1319_vm4, %v1317_v43, %v1821_v41 }
 0x599   : > { %v1825_v42 = vpop.permute.xlu1 %1824 }
 0x59a   : > { %v1827_v44 = vunpack.i.h.bf16 %v1825_v42  ;;  %v1826_v45 = vunpack.i.l.bf16 %v1825_v42 }
 0x59c   : > { %v1324_v48 = vsel %vm1322_vm5, %v1321_v46, %v1827_v44  ;;  %v1323_v49 = vsel %vm1322_vm5, %v1320_v47, %v1826_v45 }
 0x59d   : > { %v1325_v50 = vpack.c.bf16 %v1324_v48, %v1323_v49 }
 0x59f   : > { %1705 = vmatmul.mubr.msk.bf16.vlgmr.msra.gmra.mxu1 %vm345_vm1, %v1325_v50 }
 0x65f   : > { %v1386_v19 = vpop.f32.mrf.mxu1 }
 0x660   : > { %v1387_v52 = vadd.f32 %v1547_v18, %v1386_v19 }
 0x661   : > { %v1706_v51 = vpop.f32.mrf.mxu1 }
 0x662   : > { %1393 = vst.msk [vmem:[%s311_s20] sm:$0xff] %vm345_vm1, %v1387_v52 }
 0x663   : > { %v1389_v53 = vpop.f32.mrf.mxu1 }
 0x664   : > { %v1390_v54 = vadd.f32 %v1547_v18, %v1389_v53 }
 0x665   : > { %v1707_v55 = vpop.f32.mrf.mxu1 }
 0x666   : > { %1394 = vst.msk [vmem:[%s311_s20 + $0x8] sm:$0xff] %vm345_vm1, %v1390_v54 }
 0x667   : > { %1984 = shalt.err (!%p1981_p10)
}
 0x668   : > { %s1985_s19 = scalar_lea.hbm %s2451_s9, 256  ;;  %s1989_s20 = scalar_lea.hbm %s2502_s6, 512 }
 0x669   : > { %p1986_p6 = scmp.ne.s32.totalorder %s2451_s9, %s1985_s19  ;;  %p1990_p5 = scmp.lt.s32.totalorder %s2451_s9, %s2502_s6 }
 0x66a   : > { %p1991_p11 = scmp.lt.s32.totalorder %s1989_s20, %s1985_s19 }
 0x66b   : > { %p1987_p4 = pnand %p1986_p6, %p2523_p1 }
 0x66c   : > { %p1992_p3 = por %p1991_p11, %p1990_p5 }
 0x66d   : > { %p1988_p8 = pneg %p1987_p4 }
 0x66f   : > { %p1993_p7 = pnand %p1992_p3, %p1988_p8 }
 0x671   : > { %1996 = shalt.err (!%p1993_p7)
}
 0x672   : > { %s2062_s7 = smov 128  }
 0x673   : > { %1722 = dma.vmem_to_hbm [thread:$0]  (%p2523_p1), %s2446_s27, 256, %s2451_s9, %s1396_s11, %s2062_s7, %s2062_s7, %s2058_s8  }
 0x674 PF: > { %s1424_s30 = sand.u32 1, %s2031_s21   ;;  %p2524_p12 = scmp.ne.s32.totalorder %s2510_s28, 0 }
 0x675   : > { %p2525_p9 = scmp.ge.s32.totalorder %s2043_s24, 2  ;;  %s1425_s25 = scalar_lea.sflag [#allocation4], %s1424_s30 }
 0x677   : > { %p1739_p13 = pnand %p2525_p9, %p2524_p12 }
 0x679   : > { %p1740_p0 = pneg %p1739_p13 }
 0x67b   : > { %2026 = dma.done.wait (%p1740_p0), %s1425_s25, 256  }
 0x67c   : > { %2028 = vsyncadd (%p1740_p0), %s1425_s25, 4294967040  ;;  %p21_p2 = scmp.ge.s32.totalorder %s2184_s10, 4   ;;  %s2526_s21 = smov %s2035_s22 }
 0x67d   : > { %s2527_s22 = smov %s2039_s23  ;;  %s2528_s23 = smov %s2194_s13 }
 0x67e   : > { %s2529_s24 = smov %s2184_s10  ;;  %23 = sbr.rel (!%p21_p2) target bundleno = 7 (0x7), region = 101 }
 0x683   :  { %1430 = vsyncpa [#allocation3], 1 }
 0x684   :  { %1432 = vsyncpa [#allocation3 + $0x1], 1 }
 0x685   :  { %1433 = vsyncpa [#allocation6], 1 }
 0x686   :  { %1434 = vsyncpa [#allocation9], 1 }
 0x687   :  { %1435 = vsyncpa [#allocation4], 1 }
 0x688   :  { %1437 = vsyncpa [#allocation4 + $0x1], 1 }

</bundles_post_ra>
